<compile_context>
chip_gen: v5e
topology: v5e:2x2
jax: 0.10.0
libtpu: 0.0.40
codegen_flags: <defaults>
</compile_context>

<pallas_src>
import jax
import jax.numpy as jnp
from jax.experimental import pallas as pl
from jax.experimental.pallas import tpu as pltpu


def _goal_kernel(xT_ref, w1T_ref, b1_ref, w2_ref, out_ref):
    # xT_ref : (D, B*N)  -- column (b*N + n) holds sample (b, n)
    # w1T_ref: (H, D)
    # b1_ref : (H, 1)
    # w2_ref : (H, 1)
    # out_ref: (B, N)    -- lane-dense output (softmax axis on lanes)
    xT = xT_ref[...]
    w1T = w1T_ref[...]
    b1c = b1_ref[...]
    w2c = w2_ref[...]

    B, N = out_ref.shape

    # Linear(in_dim, hidden) + ReLU for all B*N samples in a single MXU matmul.
    h = jnp.dot(w1T, xT, preferred_element_type=jnp.float32) + b1c   # (H, B*N)
    h = jnp.maximum(h, 0.0)

    # Linear(hidden, 1) as a VPU multiply + reduce over H (skip the MXU matvec
    # whose result would only be 1 lane wide).  The output bias b2 is omitted:
    # it is constant over the softmax axis, so softmax is invariant to it.
    logits = jnp.sum(h * w2c, axis=0, keepdims=True)                  # (1, B*N)

    # Softmax over dim=-2 of the original (B, N, 1) layout == per-batch segment
    # of N contiguous lanes here.  B is tiny and static -> unrolled Python loop.
    for b in range(B):
        row = logits[:, b * N:(b + 1) * N]                            # (1, N)
        m = jnp.max(row, axis=-1, keepdims=True)
        e = jnp.exp(row - m)
        s = jnp.sum(e, axis=-1, keepdims=True)
        out_ref[pl.ds(b, 1), :] = (e / s).astype(out_ref.dtype)


def goal_layer_single(x, w1, b1, w2, b2=None):
    """x: (B, N, in_dim) f32; returns assign_prob (B, N, 1) f32 (softmax over N)."""
    B, N, D = x.shape
    H = w1.shape[1]

    # Layout plumbing in the wrapper (XLA-level, trivially cheap at this size).
    xT = jnp.transpose(x, (2, 0, 1)).reshape(D, B * N)   # (D, B*N)
    w1T = jnp.transpose(w1)                              # (H, D)
    b1c = jnp.reshape(b1, (H, 1))                        # (H, 1)
    w2c = jnp.reshape(w2, (H, 1))                        # (H, 1)
    # b2 intentionally not passed to the kernel: softmax is invariant to it.

    out = pl.pallas_call(
        _goal_kernel,
        out_shape=jax.ShapeDtypeStruct((B, N), jnp.float32),
        grid=(1,),  # single step; all blocks are full arrays, resident in VMEM
        in_specs=[
            pl.BlockSpec((D, B * N), lambda i: (0, 0)),
            pl.BlockSpec((H, D), lambda i: (0, 0)),
            pl.BlockSpec((H, 1), lambda i: (0, 0)),
            pl.BlockSpec((H, 1), lambda i: (0, 0)),
        ],
        out_specs=pl.BlockSpec((B, N), lambda i: (0, 0)),
        compiler_params=pltpu.CompilerParams(
            dimension_semantics=("arbitrary",)),
    )(xT, w1T, b1c, w2c)

    # TODO(synk): if B/N ever scale up, tile N (online softmax over an
    # "arbitrary" axis) and add a leading "parallel" grid axis so v7x's two
    # TensorCores both get work; unnecessary at B=2, N=8.
    return out.reshape(B, N, 1)


def _reference(x, w1, b1, w2, b2):
    h = jnp.maximum(jnp.einsum("bnd,dh->bnh", x, w1) + b1, 0.0)
    logits = jnp.einsum("bnh,ho->bno", h, w2) + b2
    return jax.nn.softmax(logits, axis=-2)


if __name__ == "__main__":
    # Small shapes consistent with the module: batch=2, N=8 targets,
    # in_dim=16 features, hidden=32.
    B, N, IN_DIM, HIDDEN = 2, 8, 16, 32

    key = jax.random.PRNGKey(0)
    kx, k1, k2, k3, k4 = jax.random.split(key, 5)

    x = jax.random.normal(kx, (B, N, IN_DIM), dtype=jnp.float32)

    # Deterministic synthetic parameter init (Linear weight/bias shapes from __init__).
    w1 = jax.random.normal(k1, (IN_DIM, HIDDEN), dtype=jnp.float32) * 0.1
    b1 = jax.random.normal(k2, (1, HIDDEN), dtype=jnp.float32) * 0.05
    w2 = jax.random.normal(k3, (HIDDEN, 1), dtype=jnp.float32) * 0.1
    b2 = jax.random.normal(k4, (1, 1), dtype=jnp.float32) * 0.05

    out = goal_layer_single(x, w1, b1, w2, b2)
    out = jax.block_until_ready(out)

    ref = _reference(x, w1, b1, w2, b2)
    assert out.shape == (B, N, 1)
    assert jnp.allclose(out, ref, atol=1e-5, rtol=1e-5), "mismatch vs reference"
    # softmax over dim=-2 sums to 1 per batch
    assert jnp.allclose(jnp.sum(out, axis=-2), 1.0, atol=1e-5)

    print("KERNEL_OK")
</pallas_src>

<mosaic_0001>
module attributes {stable_mosaic.version = 11 : i64} {
  func.func @_goal_kernel(%arg0: i32, %arg1: memref<16x16xf32, #tpu.memory_space<vmem>>, %arg2: memref<32x16xf32, #tpu.memory_space<vmem>>, %arg3: memref<32x1xf32, #tpu.memory_space<vmem>>, %arg4: memref<32x1xf32, #tpu.memory_space<vmem>>, %arg5: memref<2x8xf32, #tpu.memory_space<vmem>>) attributes {dimension_semantics = [#tpu.dimension_semantics<arbitrary>], iteration_bounds = array<i64: 1>, scalar_prefetch = 0 : i64, scratch_operands = 0 : i64, tpu.core_type = #tpu.core_type<tc>, window_params = [{pipeline_mode = #tpu.pipeline_mode<synchronous>, transform_indices = @transform_0, window_bounds = array<i64: 16, 16>}, {pipeline_mode = #tpu.pipeline_mode<synchronous>, transform_indices = @transform_1, window_bounds = array<i64: 32, 16>}, {pipeline_mode = #tpu.pipeline_mode<synchronous>, transform_indices = @transform_2, window_bounds = array<i64: 32, 1>}, {pipeline_mode = #tpu.pipeline_mode<synchronous>, transform_indices = @transform_3, window_bounds = array<i64: 32, 1>}, {pipeline_mode = #tpu.pipeline_mode<synchronous>, transform_indices = @transform_4, window_bounds = array<i64: 2, 8>}]} {
    %c0 = arith.constant 0 : index
    %c0_0 = arith.constant 0 : index
    %0 = vector.load %arg1[%c0, %c0_0] : memref<16x16xf32, #tpu.memory_space<vmem>>, vector<16x16xf32>
    %c0_1 = arith.constant 0 : index
    %c0_2 = arith.constant 0 : index
    %1 = vector.load %arg2[%c0_1, %c0_2] : memref<32x16xf32, #tpu.memory_space<vmem>>, vector<32x16xf32>
    %c0_3 = arith.constant 0 : index
    %c0_4 = arith.constant 0 : index
    %2 = vector.load %arg3[%c0_3, %c0_4] : memref<32x1xf32, #tpu.memory_space<vmem>>, vector<32x1xf32>
    %c0_5 = arith.constant 0 : index
    %c0_6 = arith.constant 0 : index
    %3 = vector.load %arg4[%c0_5, %c0_6] : memref<32x1xf32, #tpu.memory_space<vmem>>, vector<32x1xf32>
    %cst = arith.constant dense<0.000000e+00> : vector<32x16xf32>
    %4 = tpu.matmul %1, %0, %cst {dimension_numbers = #tpu.dot_dimension_numbers<[1], [0], [0], [1], [0, 0, 1, 1], [], []>} : vector<32x16xf32>, vector<16x16xf32>, vector<32x16xf32> -> vector<32x16xf32>
    %5 = vector.broadcast %2 : vector<32x1xf32> to vector<32x16xf32>
    %6 = arith.addf %4, %5 : vector<32x16xf32>
    %cst_7 = arith.constant 0.000000e+00 : f32
    %7 = vector.broadcast %cst_7 : f32 to vector<32x16xf32>
    %8 = arith.maximumf %6, %7 : vector<32x16xf32>
    %9 = vector.broadcast %3 : vector<32x1xf32> to vector<32x16xf32>
    %10 = arith.mulf %8, %9 : vector<32x16xf32>
    %cst_8 = arith.constant dense<0.000000e+00> : vector<16xf32>
    %11 = vector.multi_reduction <add>, %10, %cst_8 [0] : vector<32x16xf32> to vector<16xf32>
    %12 = vector.shape_cast %11 : vector<16xf32> to vector<1x16xf32>
    %13 = vector.extract_strided_slice %12 {offsets = [0, 0], sizes = [1, 8], strides = [1, 1]} : vector<1x16xf32> to vector<1x8xf32>
    %cst_9 = arith.constant dense<0xFF800000> : vector<1xf32>
    %14 = vector.multi_reduction <maximumf>, %13, %cst_9 [1] : vector<1x8xf32> to vector<1xf32>
    %15 = vector.shape_cast %14 : vector<1xf32> to vector<1x1xf32>
    %16 = vector.broadcast %15 : vector<1x1xf32> to vector<1x8xf32>
    %17 = arith.subf %13, %16 : vector<1x8xf32>
    %18 = math.exp %17 : vector<1x8xf32>
    %cst_10 = arith.constant dense<0.000000e+00> : vector<1xf32>
    %19 = vector.multi_reduction <add>, %18, %cst_10 [1] : vector<1x8xf32> to vector<1xf32>
    %20 = vector.shape_cast %19 : vector<1xf32> to vector<1x1xf32>
    %21 = vector.broadcast %20 : vector<1x1xf32> to vector<1x8xf32>
    %22 = arith.divf %18, %21 : vector<1x8xf32>
    %c0_11 = arith.constant 0 : index
    %c0_12 = arith.constant 0 : index
    %23 = vector.load %arg5[%c0_11, %c0_12] : memref<2x8xf32, #tpu.memory_space<vmem>>, vector<1x8xf32>
    tpu.vector_store %arg5[%c0_11, %c0_12], %22 {strides = array<i32>} : memref<2x8xf32, #tpu.memory_space<vmem>>, vector<1x8xf32>,
    %24 = vector.extract_strided_slice %12 {offsets = [0, 8], sizes = [1, 8], strides = [1, 1]} : vector<1x16xf32> to vector<1x8xf32>
    %cst_13 = arith.constant dense<0xFF800000> : vector<1xf32>
    %25 = vector.multi_reduction <maximumf>, %24, %cst_13 [1] : vector<1x8xf32> to vector<1xf32>
    %26 = vector.shape_cast %25 : vector<1xf32> to vector<1x1xf32>
    %27 = vector.broadcast %26 : vector<1x1xf32> to vector<1x8xf32>
    %28 = arith.subf %24, %27 : vector<1x8xf32>
    %29 = math.exp %28 : vector<1x8xf32>
    %cst_14 = arith.constant dense<0.000000e+00> : vector<1xf32>
    %30 = vector.multi_reduction <add>, %29, %cst_14 [1] : vector<1x8xf32> to vector<1xf32>
    %31 = vector.shape_cast %30 : vector<1xf32> to vector<1x1xf32>
    %32 = vector.broadcast %31 : vector<1x1xf32> to vector<1x8xf32>
    %33 = arith.divf %29, %32 : vector<1x8xf32>
    %c1 = arith.constant 1 : index
    %c0_15 = arith.constant 0 : index
    %34 = vector.load %arg5[%c1, %c0_15] : memref<2x8xf32, #tpu.memory_space<vmem>>, vector<1x8xf32>
    tpu.vector_store %arg5[%c1, %c0_15], %33 {strides = array<i32>} : memref<2x8xf32, #tpu.memory_space<vmem>>, vector<1x8xf32>,
    return
  }
  func.func @transform_0(%arg0: i32) -> (i32, i32) {
    %c0_i32 = arith.constant 0 : i32
    %c0_i32_0 = arith.constant 0 : i32
    %c0_i32_1 = arith.constant 0 : i32
    return %c0_i32, %c0_i32_0 : i32, i32
  }
  func.func @transform_1(%arg0: i32) -> (i32, i32) {
    %c0_i32 = arith.constant 0 : i32
    %c0_i32_0 = arith.constant 0 : i32
    %c0_i32_1 = arith.constant 0 : i32
    return %c0_i32, %c0_i32_0 : i32, i32
  }
  func.func @transform_2(%arg0: i32) -> (i32, i32) {
    %c0_i32 = arith.constant 0 : i32
    %c0_i32_0 = arith.constant 0 : i32
    %c0_i32_1 = arith.constant 0 : i32
    return %c0_i32, %c0_i32_0 : i32, i32
  }
  func.func @transform_3(%arg0: i32) -> (i32, i32) {
    %c0_i32 = arith.constant 0 : i32
    %c0_i32_0 = arith.constant 0 : i32
    %c0_i32_1 = arith.constant 0 : i32
    return %c0_i32, %c0_i32_0 : i32, i32
  }
  func.func @transform_4(%arg0: i32) -> (i32, i32) {
    %c0_i32 = arith.constant 0 : i32
    %c0_i32_0 = arith.constant 0 : i32
    %c0_i32_1 = arith.constant 0 : i32
    return %c0_i32, %c0_i32_0 : i32, i32
  }
}

</mosaic_0001>

<bundles_post_ra>
// kernel: tpu_custom_call.1
= control target key start
LH: loop header
LB: loop body
LE: loop exit
PB: predicated region body
PF: predicated region fallthrough
CT: control target
= control target key end

     0   :  { %v262_v1 = vmov 0   ;;  %vm52_vm0 = vcmask 130048   ;;  %s350_s0 = inlined_call_operand.vmem [shape: f32[16,16], index: 0, kind: input, shape index: {}]   ;;  %s351_s1 = inlined_call_operand.vmem [shape: f32[32,16], index: 1, kind: input, shape index: {}]   ;;  %s352_s2 = inlined_call_operand.vmem [shape: f32[32,1], index: 2, kind: input, shape index: {}]   ;;  %s353_s3 = inlined_call_operand.vmem [shape: f32[32,1], index: 3, kind: input, shape index: {}]   ;;  %s354_s4 = inlined_call_operand.hbm [shape: f32[2,8], index: 4, kind: output, shape index: {}]  }
   0x1   :  { %v19_v0 = vld [vmem:[%s350_s0 + $0x8] sm:$0xff]  ;;  %226 = vset.pattern.permute.xlu1 %v262_v1  ;;  %225 = vset.pattern.permute.xlu0 %v262_v1  ;;  %v26_v2 = vld [vmem:[%s352_s2 + $0x10] sm:$0xff]  ;;  %v24_v3 = vld [vmem:[%s352_s2] sm:$0xff] }
   0x2   :  { %79 = vmatpush.msra.mxu0 %v19_v0  ;;  %216 = vmatpush.msra.mxu1 %v19_v0  ;;  %v18_v4 = vld [vmem:[%s350_s0] sm:$0xff]  ;;  %v21_v6 = vld [vmem:[%s351_s1 + $0x8] sm:$0xff] }
   0x3   :  { %217 = vmatpush.msra.mxu2 %v19_v0  ;;  %218 = vmatpush.msra.mxu3 %v19_v0  ;;  %v20_v5 = vld [vmem:[%s351_s1] sm:$0xff] }
   0x4   :  { %44 = vperm.xlu1 %226, %v26_v2   ;;  %34 = vperm.xlu0 %225, %v24_v3  }
   0x5   :  { %9 = vsyncpa [#allocation3], 0  ;;  %80 = vmatpush.msra.mxu0 %v18_v4  ;;  %219 = vmatpush.msra.mxu1 %v18_v4  ;;  %v22_v7 = vld [vmem:[%s351_s1 + $0x10] sm:$0xff]  ;;  %v23_v8 = vld [vmem:[%s351_s1 + $0x18] sm:$0xff]  ;;  %vm162_vm1 = vcmask 130112   ;;  %vm135_vm2 = vcmask 64512  }
   0x6   :  { %220 = vmatpush.msra.mxu2 %v18_v4  ;;  %221 = vmatpush.msra.mxu3 %v18_v4  ;;  %v28_v9 = vld [vmem:[%s353_s3] sm:$0xff]  ;;  %v27_v10 = vld [vmem:[%s352_s2 + $0x18] sm:$0xff]  ;;  %v25_v11 = vld [vmem:[%s352_s2 + $0x8] sm:$0xff]  ;;  %s263_s2 = smov 120   ;;  %vm160_vm7 = vcmask 57344   ;;  %s203_s18 = sshll.u32 %s354_s4, 4  ;;  %s204_s18 = int_to_ptr.hbm [resolvable:$true] %s203_s18 }
   0x7   :  { %212 = vmatmul.msk.f32.vlgmr.msra.gmra.mxu0 %vm52_vm0, %v20_v5  ;;  %213 = vmatmul.msk.f32.vlgmr.msra.gmra.mxu1 %vm52_vm0, %v21_v6  ;;  %v29_v12 = vld [vmem:[%s353_s3 + $0x8] sm:$0xff]  ;;  %v31_v13 = vld [vmem:[%s353_s3 + $0x18] sm:$0xff]  ;;  %v30_v14 = vld [vmem:[%s353_s3 + $0x10] sm:$0xff]  ;;  %s264_s3 = smov [#allocation2]  }
   0x8   :  { %214 = vmatmul.msk.f32.vlgmr.msra.gmra.mxu2 %vm52_vm0, %v22_v7  ;;  %215 = vmatmul.msk.f32.vlgmr.msra.gmra.mxu3 %vm52_vm0, %v23_v8  ;;  %s201_s15 = sshll.u32 %s264_s3, 4  ;;  %s202_s15 = int_to_ptr.vmem [resolvable:$true] %s201_s15 }
   0x9   :  { %227 = vset.pattern.permute.xlu2 %v262_v1 }
   0xa   :  { %100 = vperm.xlu2 %227, %v28_v9  }
   0xc   :  { %49 = vperm.xlu1 %226, %v27_v10   ;;  %39 = vperm.xlu0 %225, %v25_v11  }
  0x12   :  { %105 = vperm.xlu2 %227, %v29_v12  }
  0x14   :  { %115 = vperm.xlu1 %226, %v31_v13   ;;  %110 = vperm.xlu0 %225, %v30_v14  }
  0x64   :  { %v101_v17 = vpop.permute.xlu2 %100 }
  0x6c   :  { %v106_v26 = vpop.permute.xlu2 %105 }
  0x76   :  { %v35_v15 = vpop.permute.xlu0 %34  ;;  %v45_v16 = vpop.permute.xlu1 %44 }
  0x7e   :  { %v40_v18 = vpop.permute.xlu0 %39  ;;  %v50_v21 = vpop.permute.xlu1 %49 }
  0x84   :  { %v82_v19 = vpop.f32.mrf.mxu0  ;;  %v85_v20 = vpop.f32.mrf.mxu1 }
  0x85   :  { %v83_v22 = vadd.f32 %v82_v19, %v35_v15  ;;  %v86_v23 = vadd.f32 %v85_v20, %v40_v18 }
  0x86   :  { %v116_v37 = vpop.permute.xlu1 %115  ;;  %v111_v38 = vpop.permute.xlu0 %110 }
  0x87   :  { %v94_v24 = vmax.f32 %v83_v22, 0.0  ;;  %v95_v25 = vmax.f32 %v86_v23, 0.0 }
  0x89   :  { %v118_v27 = vmul.f32 %v101_v17, %v94_v24  ;;  %v119_v28 = vmul.f32 %v106_v26, %v95_v25 }
  0x8b   :  { %v88_v29 = vpop.f32.mrf.mxu2  ;;  %v91_v30 = vpop.f32.mrf.mxu3  ;;  %v122_v33 = vsel %vm52_vm0, %v118_v27, 0.0  ;;  %v123_v34 = vsel %vm52_vm0, %v119_v28, 0.0 }
  0x8c   :  { %v89_v31 = vadd.f32 %v88_v29, %v45_v16  ;;  %v92_v32 = vadd.f32 %v91_v30, %v50_v21  ;;  %v124_v41 = vadd.f32 %v123_v34, %v122_v33 }
  0x8e   :  { %v96_v35 = vmax.f32 %v89_v31, 0.0  ;;  %v97_v36 = vmax.f32 %v92_v32, 0.0 }
  0x90   :  { %v120_v39 = vmul.f32 %v111_v38, %v96_v35  ;;  %v121_v40 = vmul.f32 %v116_v37, %v97_v36 }
  0x92   :  { %v125_v42 = vsel %vm52_vm0, %v120_v39, 0.0  ;;  %v127_v44 = vsel %vm52_vm0, %v121_v40, 0.0 }
  0x93   :  { %v126_v43 = vadd.f32 %v125_v42, %v124_v41 }
  0x95   :  { %v128_v45 = vadd.f32 %v127_v44, %v126_v43 }
  0x97   :  { %v129_v46 = vrot.slane %v128_v45, 4 }
  0x99   :  { %v130_v47 = vadd.f32 %v129_v46, %v128_v45 }
  0x9b   :  { %v131_v48 = vrot.slane %v130_v47, 2 }
  0x9d   :  { %v132_v49 = vadd.f32 %v131_v48, %v130_v47 }
  0x9f   :  { %v133_v50 = vrot.slane %v132_v49, 1 }
  0xa1   :  { %v134_v51 = vadd.f32 %v133_v50, %v132_v49 }
  0xa3   :  { %v163_v52 = vsel %vm162_vm1, %v134_v51, -inf  ;;  %v136_v53 = vsel %vm135_vm2, %v134_v51, -inf }
  0xa4   :  { %164 = vmax.xlane.f32.xlu2 %v163_v52  ;;  %137 = vmax.xlane.f32.xlu1 %v136_v53 }
 0x117   :  { %v165_v54 = vpop.xlane.xlu2 %164  ;;  %v138_v55 = vpop.xlane.xlu1 %137 }
 0x118   :  { %v166_v56 = vsub.f32 %v134_v51, %v165_v54  ;;  %v139_v57 = vsub.f32 %v134_v51, %v138_v55 }
 0x11a   :  { %v167_v58 = vmul.f32 1.442695, %v166_v56  ;;  %v140_v59 = vmul.f32 1.442695, %v139_v57 }
 0x11c   :  { %228 = vpow2.f32 %v167_v58 }
 0x11d   :  { %230 = vpow2.f32 %v140_v59 }
 0x122   :  { %v229_v60 = vpop.eup %228 }
 0x123   :  { %v231_v61 = vpop.eup %230  ;;  %170 = vrot.lane.b32.xlu0 %v229_v60, %s263_s2 }
 0x124   :  { %v142_v62 = vsel %vm135_vm2, %v231_v61, 0.0 }
 0x125   :  { %143 = vadd.xlane.f32.xlu2 %v142_v62 }
 0x195   :  { %v171_v63 = vpop.permute.xlu0 %170 }
 0x196   :  { %v173_v0 = vsel %vm135_vm2, %v171_v63, 0.0 }
 0x197   :  { %174 = vadd.xlane.f32.xlu0 %v173_v0 }
 0x198   :  { %v144_v1 = vpop.xlane.xlu2 %143 }
 0x199   :  { %232 = vrcp.f32 %v144_v1  ;;  %v156_v5 = vand.u32 2147483648, %v144_v1  ;;  %v154_v7 = vand.u32 2147483647, %v144_v1  ;;  %vm150_vm4 = vweird.f32 %v144_v1 }
 0x19b   :  { %v157_v9 = vor.u32 1.1754944e-38, %v156_v5  ;;  %vm155_vm6 = vcmp.eq.f32.partialorder %v154_v7, 8.507059e+37 }
 0x19f   :  { %v233_v2 = vpop.eup %232 }
 0x1a0   :  { %v146_v3 = vmul.f32 %v233_v2, %v144_v1  ;;  %vm151_vm3 = vweird.f32 %v233_v2 }
 0x1a1   :  { %vm152_vm5 = vmor %vm150_vm4, %vm151_vm3 }
 0x1a2   :  { %v147_v4 = vsub.f32 1.0, %v146_v3 }
 0x1a4   :  { %v148_v6 = vmul.f32 %v233_v2, %v147_v4 }
 0x1a6   :  { %v149_v8 = vadd.f32 %v233_v2, %v148_v6 }
 0x1a8   :  { %v153_v10 = vsel %vm152_vm5, %v233_v2, %v149_v8 }
 0x1a9   :  { %v158_v11 = vsel %vm155_vm6, %v157_v9, %v153_v10 }
 0x1aa   :  { %v159_v12 = vmul.f32 %v231_v61, %v158_v11 }
 0x1ac   :  { %161 = vst.msk [vmem:[#allocation2] sm:$0x1] %vm160_vm7, %v159_v12 }
 0x20a   :  { %v175_v13 = vpop.xlane.xlu0 %174 }
 0x20b   :  { %234 = vrcp.f32 %v175_v13  ;;  %v187_v17 = vand.u32 2147483648, %v175_v13  ;;  %v185_v19 = vand.u32 2147483647, %v175_v13  ;;  %vm181_vm9 = vweird.f32 %v175_v13 }
 0x20d   :  { %v188_v21 = vor.u32 1.1754944e-38, %v187_v17  ;;  %vm186_vm11 = vcmp.eq.f32.partialorder %v185_v19, 8.507059e+37 }
 0x211   :  { %v235_v14 = vpop.eup %234 }
 0x212   :  { %v177_v15 = vmul.f32 %v235_v14, %v175_v13  ;;  %vm182_vm8 = vweird.f32 %v235_v14 }
 0x213   :  { %vm183_vm10 = vmor %vm181_vm9, %vm182_vm8 }
 0x214   :  { %v178_v16 = vsub.f32 1.0, %v177_v15 }
 0x216   :  { %v179_v18 = vmul.f32 %v235_v14, %v178_v16 }
 0x218   :  { %v180_v20 = vadd.f32 %v235_v14, %v179_v18 }
 0x21a   :  { %v184_v22 = vsel %vm183_vm10, %v235_v14, %v180_v20 }
 0x21b   :  { %v189_v23 = vsel %vm186_vm11, %v188_v21, %v184_v22 }
 0x21c   :  { %v190_v24 = vmul.f32 %v229_v60, %v189_v23 }
 0x21e   :  { %192 = vrot.lane.b32.xlu2 %v190_v24, %s263_s2 }
 0x278   :  { %v193_v25 = vpop.permute.xlu2 %192 }
 0x279   :  { %195 = vst.msk [vmem:[#allocation2 + $0x1] sm:$0x1] %vm160_vm7, %v193_v25 }
 0x27a   :  { %206 = dma.vmem_to_hbm [thread:$0]  %s202_s15, 32, %s204_s18, [#allocation3]  }
 0x27b   :  { %260 = dma.done.wait [#allocation3], 32  }
 0x27c   :  { %261 = vsyncadd [#allocation3], 4294967264 }
 0x27d   :  { %211 = vsyncpa [#allocation3], 1 }

</bundles_post_ra>
